<compile_context>
chip_gen: v5e
topology: v5e:2x2
jax: 0.10.0
libtpu: 0.0.40
codegen_flags: <defaults>
</compile_context>

<pallas_src>
import jax
import jax.numpy as jnp
from jax.experimental import pallas as pl
from jax.experimental.pallas import tpu as pltpu


def find_multiple(n: int, k: int) -> int:
    if n % k == 0:
        return n
    return n + k - n % k


def _sublane_multiple(dtype) -> int:
    # sublanes pack 32 bits: 8 rows for f32, 16 for bf16, 32 for int8/fp8
    return max(8, 32 // jnp.dtype(dtype).itemsize)


def _pick_hidden_tile(H: int, desired: int, granularity: int = 128) -> int:
    assert H % granularity == 0, "hidden dim must be a multiple of 128"
    t = min(desired, H)
    t -= t % granularity
    t = max(t, granularity)
    while H % t != 0:
        t -= granularity
    return t


def ffn_kernel(x_ref, w1_ref, w3_ref, w2_ref, o_ref, acc_ref):
    """Grid = (row tiles, hidden tiles); hidden axis is the reduction.

    x_ref  : [tT, D]   row tile of activations
    w1_ref : [D, th]   hidden slice h of W1^T
    w3_ref : [D, th]   hidden slice h of W3^T
    w2_ref : [th, D]   hidden slice h of W2^T
    o_ref  : [tT, D]   output row tile (written on the last hidden step)
    acc_ref: [tT, D]   f32 accumulator scratch
    """
    h = pl.program_id(1)

    @pl.when(h == 0)
    def _():
        acc_ref[...] = jnp.zeros_like(acc_ref)

    x = x_ref[...]
    g = jnp.dot(x, w1_ref[...], preferred_element_type=jnp.float32)
    u = jnp.dot(x, w3_ref[...], preferred_element_type=jnp.float32)
    a = (g * jax.nn.sigmoid(g)) * u                       # SwiGLU, f32 (EUP sigmoid)
    acc_ref[...] += jnp.dot(a.astype(w2_ref.dtype), w2_ref[...],
                            preferred_element_type=jnp.float32)

    @pl.when(h == pl.num_programs(1) - 1)
    def _():
        o_ref[...] = acc_ref[...].astype(o_ref.dtype)


def feed_forward(x, w1t, w3t, w2t, *, tile_rows: int = 512, tile_hidden: int = 512):
    """x: [..., D] -> [..., D].  w1t/w3t: [D, H], w2t: [H, D] (pre-transposed)."""
    orig_shape = x.shape
    D = orig_shape[-1]
    H = w1t.shape[1]
    assert w1t.shape == (D, H) and w3t.shape == (D, H) and w2t.shape == (H, D)

    x2d = x.reshape(-1, D)
    T = x2d.shape[0]
    sub = _sublane_multiple(x.dtype)
    isz = jnp.dtype(x.dtype).itemsize

    # --- initial tile choice ---
    th = _pick_hidden_tile(H, tile_hidden)
    tT = tile_rows if T >= tile_rows else find_multiple(T, sub)

    # --- shrink tiles until the double-buffered working set fits VMEM ---
    try:
        phys_vmem = pltpu.get_tpu_info().vmem_capacity_bytes
    except Exception:
        phys_vmem = 64 << 20            # conservative (v7x per-TC)
    budget = int(0.80 * phys_vmem)

    def vmem_est(tT_, th_):
        return (4 * tT_ * D * isz       # x + out tiles, double-buffered
                + 4 * D * th_ * isz     # W1^T + W3^T slabs, double-buffered
                + 2 * th_ * D * isz     # W2^T slab, double-buffered
                + tT_ * D * 4)          # f32 accumulator

    while vmem_est(tT, th) > budget:
        if th > 128:
            th = _pick_hidden_tile(H, max(128, th // 2))
        elif tT > sub:
            tT = max(sub, find_multiple(tT // 2, sub))
        else:
            break
    n_h = H // th

    # --- row padding to the chosen tile ---
    T_pad = find_multiple(T, tT)
    if T_pad != T:
        x2d = jnp.pad(x2d, ((0, T_pad - T), (0, 0)))
    n_t = T_pad // tT

    vmem_limit = min(max(int(1.25 * vmem_est(tT, th)), 32 << 20), budget)

    cost = pl.CostEstimate(
        flops=6 * T_pad * D * H,                      # three matmuls
        transcendentals=T_pad * H,                    # sigmoid
        bytes_accessed=2 * T_pad * D * isz + n_t * 3 * D * H * isz,
    )

    out = pl.pallas_call(
        ffn_kernel,
        out_shape=jax.ShapeDtypeStruct((T_pad, D), x.dtype),
        grid_spec=pltpu.PrefetchScalarGridSpec(
            num_scalar_prefetch=0,
            grid=(n_t, n_h),                                   # reduction axis last
            in_specs=[
                pl.BlockSpec((tT, D), lambda t, h: (t, 0)),    # x row tile
                pl.BlockSpec((D, th), lambda t, h: (0, h)),    # W1^T hidden slab
                pl.BlockSpec((D, th), lambda t, h: (0, h)),    # W3^T hidden slab
                pl.BlockSpec((th, D), lambda t, h: (h, 0)),    # W2^T hidden slab
            ],
            out_specs=pl.BlockSpec((tT, D), lambda t, h: (t, 0)),
            scratch_shapes=[pltpu.VMEM((tT, D), jnp.float32)],
        ),
        compiler_params=pltpu.CompilerParams(
            dimension_semantics=("parallel", "arbitrary"),
            vmem_limit_bytes=vmem_limit,
        ),
        cost_estimate=cost,
    )(x2d, w1t, w3t, w2t)

    return out[:T].reshape(orig_shape)


def feed_forward_ref(x, w1t, w3t, w2t):
    g = (x @ w1t).astype(jnp.float32)
    u = (x @ w3t).astype(jnp.float32)
    a = (g * jax.nn.sigmoid(g)) * u
    return (a @ w2t.astype(jnp.float32)).astype(x.dtype)


if __name__ == "__main__":
    # Small config consistent with the module's __init__ math:
    #   dim=128, multiple_of=128 -> hidden = find_multiple(int(2*4*128/3), 128) = 384
    dim = 128
    multiple_of = 128
    hidden_dim = 4 * dim
    hidden_dim = int(2 * hidden_dim / 3)
    hidden_dim = find_multiple(hidden_dim, multiple_of)    # 384

    batch, seq = 2, 8
    key = jax.random.PRNGKey(0)
    kx, k1, k2, k3 = jax.random.split(key, 4)

    x = jax.random.normal(kx, (batch, seq, dim), dtype=jnp.float32)
    # nn.Linear(dim, hidden) weight has shape [hidden, dim]; store transposed.
    scale = 0.02
    w1t = (scale * jax.random.normal(k1, (hidden_dim, dim), jnp.float32)).T
    w3t = (scale * jax.random.normal(k3, (hidden_dim, dim), jnp.float32)).T
    w2t = (scale * jax.random.normal(k2, (dim, hidden_dim), jnp.float32)).T

    # f32 path: strict check against reference
    y = feed_forward(x, w1t, w3t, w2t)
    y = jax.block_until_ready(y)
    y_ref = feed_forward_ref(x, w1t, w3t, w2t)
    assert y.shape == x.shape
    assert jnp.allclose(y, y_ref, atol=1e-5, rtol=1e-5), "f32 mismatch vs reference"

    # bf16 path (production dtype): loose check
    xb, w1b, w3b, w2b = (a.astype(jnp.bfloat16) for a in (x, w1t, w3t, w2t))
    yb = feed_forward(xb, w1b, w3b, w2b)
    yb = jax.block_until_ready(yb)
    yb_ref = feed_forward_ref(xb.astype(jnp.float32), w1b.astype(jnp.float32),
                              w3b.astype(jnp.float32), w2b.astype(jnp.float32))
    assert yb.shape == x.shape
    assert jnp.allclose(yb.astype(jnp.float32), yb_ref, atol=2e-3, rtol=5e-2), \
        "bf16 mismatch vs reference"

    print("KERNEL_OK")
</pallas_src>

<mosaic_0001>
module attributes {stable_mosaic.version = 11 : i64} {
  func.func @ffn_kernel(%arg0: i32, %arg1: i32, %arg2: memref<16x128xf32, #tpu.memory_space<vmem>>, %arg3: memref<128x384xf32, #tpu.memory_space<vmem>>, %arg4: memref<128x384xf32, #tpu.memory_space<vmem>>, %arg5: memref<384x128xf32, #tpu.memory_space<vmem>>, %arg6: memref<16x128xf32, #tpu.memory_space<vmem>>, %arg7: memref<16x128xf32, #tpu.memory_space<vmem>>) attributes {dimension_semantics = [#tpu.dimension_semantics<parallel>, #tpu.dimension_semantics<arbitrary>], iteration_bounds = array<i64: 1, 1>, scalar_prefetch = 0 : i64, scratch_operands = 1 : i64, tpu.core_type = #tpu.core_type<tc>, window_params = [{transform_indices = @transform_0, window_bounds = array<i64: 16, 128>}, {transform_indices = @transform_1, window_bounds = array<i64: 128, 384>}, {transform_indices = @transform_2, window_bounds = array<i64: 128, 384>}, {transform_indices = @transform_3, window_bounds = array<i64: 384, 128>}, {transform_indices = @transform_4, window_bounds = array<i64: 16, 128>}]} {
    %c0_i32 = arith.constant 0 : i32
    %0 = arith.cmpi eq, %arg1, %c0_i32 : i32
    %1 = arith.extui %0 : i1 to i32
    %c0_i32_0 = arith.constant 0 : i32
    %2 = arith.cmpi ne, %1, %c0_i32_0 : i32
    scf.if %2 {
      %cst_17 = arith.constant 0.000000e+00 : f32
      %23 = vector.broadcast %cst_17 : f32 to vector<16x128xf32>
      %c0_18 = arith.constant 0 : index
      %c0_19 = arith.constant 0 : index
      %24 = vector.load %arg7[%c0_18, %c0_19] : memref<16x128xf32, #tpu.memory_space<vmem>>, vector<16x128xf32>
      tpu.vector_store %arg7[%c0_18, %c0_19], %23 {strides = array<i32>} : memref<16x128xf32, #tpu.memory_space<vmem>>, vector<16x128xf32>,
    } else {
    }
    %c0 = arith.constant 0 : index
    %c0_1 = arith.constant 0 : index
    %3 = vector.load %arg2[%c0, %c0_1] : memref<16x128xf32, #tpu.memory_space<vmem>>, vector<16x128xf32>
    %c0_2 = arith.constant 0 : index
    %c0_3 = arith.constant 0 : index
    %4 = vector.load %arg3[%c0_2, %c0_3] : memref<128x384xf32, #tpu.memory_space<vmem>>, vector<128x384xf32>
    %cst = arith.constant dense<0.000000e+00> : vector<16x384xf32>
    %5 = tpu.matmul %3, %4, %cst {dimension_numbers = #tpu.dot_dimension_numbers<[1], [0], [0], [1], [0, 0, 1, 1], [], []>} : vector<16x128xf32>, vector<128x384xf32>, vector<16x384xf32> -> vector<16x384xf32>
    %c0_4 = arith.constant 0 : index
    %c0_5 = arith.constant 0 : index
    %6 = vector.load %arg4[%c0_4, %c0_5] : memref<128x384xf32, #tpu.memory_space<vmem>>, vector<128x384xf32>
    %cst_6 = arith.constant dense<0.000000e+00> : vector<16x384xf32>
    %7 = tpu.matmul %3, %6, %cst_6 {dimension_numbers = #tpu.dot_dimension_numbers<[1], [0], [0], [1], [0, 0, 1, 1], [], []>} : vector<16x128xf32>, vector<128x384xf32>, vector<16x384xf32> -> vector<16x384xf32>
    %8 = arith.negf %5 : vector<16x384xf32>
    %9 = math.exp %8 : vector<16x384xf32>
    %cst_7 = arith.constant 1.000000e+00 : f32
    %10 = vector.broadcast %cst_7 : f32 to vector<16x384xf32>
    %11 = arith.addf %10, %9 : vector<16x384xf32>
    %12 = arith.divf %10, %11 : vector<16x384xf32>
    %13 = arith.mulf %5, %12 : vector<16x384xf32>
    %14 = arith.mulf %13, %7 : vector<16x384xf32>
    %c0_8 = arith.constant 0 : index
    %c0_9 = arith.constant 0 : index
    %15 = vector.load %arg7[%c0_8, %c0_9] : memref<16x128xf32, #tpu.memory_space<vmem>>, vector<16x128xf32>
    %c0_10 = arith.constant 0 : index
    %c0_11 = arith.constant 0 : index
    %16 = vector.load %arg5[%c0_10, %c0_11] : memref<384x128xf32, #tpu.memory_space<vmem>>, vector<384x128xf32>
    %cst_12 = arith.constant dense<0.000000e+00> : vector<16x128xf32>
    %17 = tpu.matmul %14, %16, %cst_12 {dimension_numbers = #tpu.dot_dimension_numbers<[1], [0], [0], [1], [0, 0, 1, 1], [], []>} : vector<16x384xf32>, vector<384x128xf32>, vector<16x128xf32> -> vector<16x128xf32>
    %18 = arith.addf %15, %17 : vector<16x128xf32>
    %c0_13 = arith.constant 0 : index
    %c0_14 = arith.constant 0 : index
    %19 = vector.load %arg7[%c0_13, %c0_14] : memref<16x128xf32, #tpu.memory_space<vmem>>, vector<16x128xf32>
    tpu.vector_store %arg7[%c0_13, %c0_14], %18 {strides = array<i32>} : memref<16x128xf32, #tpu.memory_space<vmem>>, vector<16x128xf32>,
    %c0_i32_15 = arith.constant 0 : i32
    %20 = arith.cmpi eq, %arg1, %c0_i32_15 : i32
    %21 = arith.extui %20 : i1 to i32
    %c0_i32_16 = arith.constant 0 : i32
    %22 = arith.cmpi ne, %21, %c0_i32_16 : i32
    scf.if %22 {
      %c0_17 = arith.constant 0 : index
      %c0_18 = arith.constant 0 : index
      %23 = vector.load %arg7[%c0_17, %c0_18] : memref<16x128xf32, #tpu.memory_space<vmem>>, vector<16x128xf32>
      %c0_19 = arith.constant 0 : index
      %c0_20 = arith.constant 0 : index
      %24 = vector.load %arg6[%c0_19, %c0_20] : memref<16x128xf32, #tpu.memory_space<vmem>>, vector<16x128xf32>
      tpu.vector_store %arg6[%c0_19, %c0_20], %23 {strides = array<i32>} : memref<16x128xf32, #tpu.memory_space<vmem>>, vector<16x128xf32>,
    } else {
    }
    return
  }
  func.func @transform_0(%arg0: i32, %arg1: i32) -> (i32, i32) {
    %c0_i32 = arith.constant 0 : i32
    %c0_i32_0 = arith.constant 0 : i32
    return %arg0, %c0_i32 : i32, i32
  }
  func.func @transform_1(%arg0: i32, %arg1: i32) -> (i32, i32) {
    %c0_i32 = arith.constant 0 : i32
    %c0_i32_0 = arith.constant 0 : i32
    return %c0_i32, %arg1 : i32, i32
  }
  func.func @transform_2(%arg0: i32, %arg1: i32) -> (i32, i32) {
    %c0_i32 = arith.constant 0 : i32
    %c0_i32_0 = arith.constant 0 : i32
    return %c0_i32, %arg1 : i32, i32
  }
  func.func @transform_3(%arg0: i32, %arg1: i32) -> (i32, i32) {
    %c0_i32 = arith.constant 0 : i32
    %c0_i32_0 = arith.constant 0 : i32
    return %arg1, %c0_i32 : i32, i32
  }
  func.func @transform_4(%arg0: i32, %arg1: i32) -> (i32, i32) {
    %c0_i32 = arith.constant 0 : i32
    %c0_i32_0 = arith.constant 0 : i32
    return %arg0, %c0_i32 : i32, i32
  }
}

</mosaic_0001>

<bundles_post_ra>
// kernel: tpu_custom_call.1
= control target key start
LH: loop header
LB: loop body
LE: loop exit
PB: predicated region body
PF: predicated region fallthrough
CT: control target
= control target key end

     0   :  { %9 = vsyncpa [#allocation4], 0  ;;  %s909_s0 = inlined_call_operand.hbm [shape: f32[16,128], index: 0, kind: input, shape index: {}]   ;;  %s910_s1 = inlined_call_operand.hbm [shape: f32[128,384], index: 1, kind: input, shape index: {}]   ;;  %s911_s2 = inlined_call_operand.hbm [shape: f32[128,384], index: 2, kind: input, shape index: {}]   ;;  %s912_s3 = inlined_call_operand.hbm [shape: f32[384,128], index: 3, kind: input, shape index: {}]   ;;  %s913_s4 = inlined_call_operand.hbm [shape: f32[16,128], index: 4, kind: output, shape index: {}]  }
   0x1   :  { %10 = vsyncpa [#allocation7], 0 }
   0x2   :  { %11 = vsyncpa [#allocation10], 0  ;;  %s30_s17 = sshll.u32 %s910_s1, 4  ;;  %s31_s17 = int_to_ptr.hbm [resolvable:$true] %s30_s17 }
   0x3   :  { %12 = vsyncpa [#allocation5], 0  ;;  %s783_s18 = smov [#allocation6]   ;;  %s17_s22 = sshll.u32 %s909_s0, 4  ;;  %s18_s22 = int_to_ptr.hbm [resolvable:$true] %s17_s22 }
   0x4   :  { %s32_s19 = sshll.u32 %s783_s18, 4  ;;  %s784_s23 = smov 384   ;;  %s33_s19 = int_to_ptr.vmem [resolvable:$true] %s32_s19 }
   0x5   :  { %s785_s24 = smov 24   ;;  %s786_s25 = smov [#allocation3]  }
   0x6   :  { %38 = dma.hbm_to_vmem [thread:$0]  %s31_s17, 6144, %s33_s19, [#allocation7], %s784_s23, %s784_s23, %s785_s24  }
   0x7   :  { %s19_s26 = sshll.u32 %s786_s25, 4  ;;  %s787_s27 = smov 128   ;;  %s20_s26 = int_to_ptr.vmem [resolvable:$true] %s19_s26 }
   0x8   :  { %s788_s28 = smov 8   ;;  %s43_s30 = sshll.u32 %s911_s2, 4  ;;  %s44_s30 = int_to_ptr.hbm [resolvable:$true] %s43_s30 }
   0x9   :  { %25 = dma.hbm_to_vmem [thread:$0]  %s18_s22, 256, %s20_s26, [#allocation4], %s787_s27, %s787_s27, %s788_s28  }
   0xa   :  { %s789_s5 = smov [#allocation8]   ;;  %s56_s8 = sshll.u32 %s912_s3, 4  ;;  %s57_s8 = int_to_ptr.hbm [resolvable:$true] %s56_s8 }
   0xb   :  { %s45_s0 = sshll.u32 %s789_s5, 4  ;;  %s790_s9 = smov [#allocation9]   ;;  %s46_s0 = int_to_ptr.vmem [resolvable:$true] %s45_s0 }
   0xc   :  { %51 = dma.hbm_to_vmem [thread:$0]  %s44_s30, 6144, %s46_s0, [#allocation7], %s784_s23, %s784_s23, %s785_s24  }
   0xd   :  { %s58_s10 = sshll.u32 %s790_s9, 4  ;;  %s59_s10 = int_to_ptr.vmem [resolvable:$true] %s58_s10 }
   0xe   :  { %64 = dma.hbm_to_vmem [thread:$0]  %s57_s8, 6144, %s59_s10, [#allocation10], %s787_s27, %s787_s27, %s788_s28  }
   0xf   :  { %775 = dma.done.wait [#allocation4], 256  }
  0x10   :  { %776 = vsyncadd [#allocation4], 4294967040 }
  0x11   :  { %777 = dma.done.wait [#allocation7], 12288  }
  0x12   :  { %778 = vsyncadd [#allocation7], 4294955008 }
  0x13   :  { %779 = dma.done.wait [#allocation10], 6144  }
  0x14   :  { %780 = vsyncadd [#allocation10], 4294961152  ;;  %v134_v0 = vld [vmem:[#allocation6 + $0x168] sm:$0xff]  ;;  %v135_v1 = vld [vmem:[#allocation6 + $0x170] sm:$0xff]  ;;  %s791_s2 = smov [#allocation11]   ;;  %s585_s13 = sshll.u32 %s913_s4, 4  ;;  %s586_s13 = int_to_ptr.hbm [resolvable:$true] %s585_s13 }
  0x15   :  { %v136_v2 = vld [vmem:[#allocation6 + $0x178] sm:$0xff]  ;;  %137 = vmatpush.msra.mxu0 %v134_v0  ;;  %160 = vmatpush.msra.mxu1 %v135_v1  ;;  %v131_v3 = vld [vmem:[#allocation6 + $0x150] sm:$0xff]  ;;  %v133_v5 = vld [vmem:[#allocation6 + $0x160] sm:$0xff]  ;;  %s583_s3 = sshll.u32 %s791_s2, 4  ;;  %s584_s3 = int_to_ptr.vmem [resolvable:$true] %s583_s3 }
  0x16   :  { %v132_v4 = vld [vmem:[#allocation6 + $0x158] sm:$0xff]  ;;  %183 = vmatpush.msra.mxu2 %v136_v2  ;;  %v129_v7 = vld [vmem:[#allocation6 + $0x140] sm:$0xff]  ;;  %v130_v8 = vld [vmem:[#allocation6 + $0x148] sm:$0xff] }
  0x17   :  { %v128_v6 = vld [vmem:[#allocation6 + $0x138] sm:$0xff]  ;;  %138 = vmatpush.msra.mxu0 %v131_v3  ;;  %161 = vmatpush.msra.mxu1 %v132_v4  ;;  %v125_v9 = vld [vmem:[#allocation6 + $0x120] sm:$0xff]  ;;  %v126_v10 = vld [vmem:[#allocation6 + $0x128] sm:$0xff] }
  0x18   :  { %184 = vmatpush.msra.mxu2 %v133_v5  ;;  %v127_v11 = vld [vmem:[#allocation6 + $0x130] sm:$0xff]  ;;  %v122_v12 = vld [vmem:[#allocation6 + $0x108] sm:$0xff]  ;;  %v124_v14 = vld [vmem:[#allocation6 + $0x118] sm:$0xff] }
  0x19   :  { %139 = vmatpush.msra.mxu0 %v128_v6  ;;  %162 = vmatpush.msra.mxu1 %v129_v7  ;;  %v123_v13 = vld [vmem:[#allocation6 + $0x110] sm:$0xff]  ;;  %v120_v16 = vld [vmem:[#allocation6 + $0xf8] sm:$0xff]  ;;  %v121_v17 = vld [vmem:[#allocation6 + $0x100] sm:$0xff] }
  0x1a   :  { %185 = vmatpush.msra.mxu2 %v130_v8  ;;  %v119_v15 = vld [vmem:[#allocation6 + $0xf0] sm:$0xff]  ;;  %v116_v18 = vld [vmem:[#allocation6 + $0xd8] sm:$0xff]  ;;  %v117_v19 = vld [vmem:[#allocation6 + $0xe0] sm:$0xff] }
  0x1b   :  { %140 = vmatpush.msra.mxu0 %v125_v9  ;;  %163 = vmatpush.msra.mxu1 %v126_v10  ;;  %v118_v20 = vld [vmem:[#allocation6 + $0xe8] sm:$0xff]  ;;  %v113_v21 = vld [vmem:[#allocation6 + $0xc0] sm:$0xff]  ;;  %v115_v23 = vld [vmem:[#allocation6 + $0xd0] sm:$0xff] }
  0x1c   :  { %186 = vmatpush.msra.mxu2 %v127_v11  ;;  %v114_v22 = vld [vmem:[#allocation6 + $0xc8] sm:$0xff]  ;;  %v111_v26 = vld [vmem:[#allocation6 + $0xb0] sm:$0xff]  ;;  %v112_v28 = vld [vmem:[#allocation6 + $0xb8] sm:$0xff] }
  0x1d   :  { %141 = vmatpush.msra.mxu0 %v122_v12  ;;  %164 = vmatpush.msra.mxu1 %v123_v13  ;;  %v251_v24 = vld [vmem:[#allocation8 + $0x168] sm:$0xff]  ;;  %v248_v27 = vld [vmem:[#allocation8 + $0x150] sm:$0xff]  ;;  %v245_v29 = vld [vmem:[#allocation8 + $0x138] sm:$0xff] }
  0x1e   :  { %187 = vmatpush.msra.mxu2 %v124_v14  ;;  %v110_v25 = vld [vmem:[#allocation6 + $0xa8] sm:$0xff]  ;;  %254 = vmatpush.msra.mxu3 %v251_v24  ;;  %v107_v30 = vld [vmem:[#allocation6 + $0x90] sm:$0xff]  ;;  %v108_v31 = vld [vmem:[#allocation6 + $0x98] sm:$0xff] }
  0x1f   :  { %142 = vmatpush.msra.mxu0 %v119_v15  ;;  %165 = vmatpush.msra.mxu1 %v120_v16  ;;  %v109_v32 = vld [vmem:[#allocation6 + $0xa0] sm:$0xff]  ;;  %v104_v34 = vld [vmem:[#allocation6 + $0x78] sm:$0xff]  ;;  %v106_v36 = vld [vmem:[#allocation6 + $0x88] sm:$0xff] }
  0x20   :  { %188 = vmatpush.msra.mxu2 %v121_v17  ;;  %255 = vmatpush.msra.mxu3 %v248_v27  ;;  %v242_v33 = vld [vmem:[#allocation8 + $0x120] sm:$0xff]  ;;  %v239_v37 = vld [vmem:[#allocation8 + $0x108] sm:$0xff]  ;;  %v103_v40 = vld [vmem:[#allocation6 + $0x70] sm:$0xff] }
  0x21   :  { %143 = vmatpush.msra.mxu0 %v116_v18  ;;  %166 = vmatpush.msra.mxu1 %v117_v19  ;;  %v105_v35 = vld [vmem:[#allocation6 + $0x80] sm:$0xff]  ;;  %v102_v39 = vld [vmem:[#allocation6 + $0x68] sm:$0xff]  ;;  %v236_v41 = vld [vmem:[#allocation8 + $0xf0] sm:$0xff] }
  0x22   :  { %189 = vmatpush.msra.mxu2 %v118_v20  ;;  %256 = vmatpush.msra.mxu3 %v245_v29  ;;  %v101_v38 = vld [vmem:[#allocation6 + $0x60] sm:$0xff]  ;;  %v98_v42 = vld [vmem:[#allocation6 + $0x48] sm:$0xff]  ;;  %v99_v43 = vld [vmem:[#allocation6 + $0x50] sm:$0xff] }
  0x23   :  { %144 = vmatpush.msra.mxu0 %v113_v21  ;;  %167 = vmatpush.msra.mxu1 %v114_v22  ;;  %v100_v44 = vld [vmem:[#allocation6 + $0x58] sm:$0xff]  ;;  %v95_v46 = vld [vmem:[#allocation6 + $0x30] sm:$0xff]  ;;  %v97_v48 = vld [vmem:[#allocation6 + $0x40] sm:$0xff] }
  0x24   :  { %190 = vmatpush.msra.mxu2 %v115_v23  ;;  %257 = vmatpush.msra.mxu3 %v242_v33  ;;  %v233_v45 = vld [vmem:[#allocation8 + $0xd8] sm:$0xff]  ;;  %v230_v49 = vld [vmem:[#allocation8 + $0xc0] sm:$0xff]  ;;  %v94_v52 = vld [vmem:[#allocation6 + $0x28] sm:$0xff] }
  0x25   :  { %145 = vmatpush.msra.mxu0 %v110_v25  ;;  %168 = vmatpush.msra.mxu1 %v111_v26  ;;  %v96_v47 = vld [vmem:[#allocation6 + $0x38] sm:$0xff]  ;;  %v93_v51 = vld [vmem:[#allocation6 + $0x20] sm:$0xff]  ;;  %v227_v53 = vld [vmem:[#allocation8 + $0xa8] sm:$0xff] }
  0x26   :  { %191 = vmatpush.msra.mxu2 %v112_v28  ;;  %258 = vmatpush.msra.mxu3 %v239_v37  ;;  %v92_v50 = vld [vmem:[#allocation6 + $0x18] sm:$0xff]  ;;  %v89_v54 = vld [vmem:[#allocation6] sm:$0xff]  ;;  %v90_v55 = vld [vmem:[#allocation6 + $0x8] sm:$0xff] }
  0x27   :  { %146 = vmatpush.msra.mxu0 %v107_v30  ;;  %169 = vmatpush.msra.mxu1 %v108_v31  ;;  %v91_v56 = vld [vmem:[#allocation6 + $0x10] sm:$0xff]  ;;  %v253_v59 = vld [vmem:[#allocation8 + $0x178] sm:$0xff]  ;;  %v250_v62 = vld [vmem:[#allocation8 + $0x160] sm:$0xff] }
  0x28   :  { %192 = vmatpush.msra.mxu2 %v109_v32  ;;  %259 = vmatpush.msra.mxu3 %v236_v41  ;;  %v835_v57 = vld [vmem:[#allocation3] sm:$0xff]  ;;  %v249_v61 = vld [vmem:[#allocation8 + $0x158] sm:$0xff]  ;;  %v246_v0 = vld [vmem:[#allocation8 + $0x140] sm:$0xff] }
  0x29   :  { %147 = vmatpush.msra.mxu0 %v104_v34  ;;  %170 = vmatpush.msra.mxu1 %v105_v35  ;;  %v252_v58 = vld [vmem:[#allocation8 + $0x170] sm:$0xff]  ;;  %v221_v63 = vld [vmem:[#allocation8 + $0x78] sm:$0xff]  ;;  %v247_v1 = vld [vmem:[#allocation8 + $0x148] sm:$0xff] }
  0x2a   :  { %193 = vmatpush.msra.mxu2 %v106_v36  ;;  %260 = vmatpush.msra.mxu3 %v233_v45  ;;  %v224_v60 = vld [vmem:[#allocation8 + $0x90] sm:$0xff]  ;;  %v218_v2 = vld [vmem:[#allocation8 + $0x60] sm:$0xff]  ;;  %v243_v3 = vld [vmem:[#allocation8 + $0x128] sm:$0xff] }
  0x2b   :  { %148 = vmatpush.msra.mxu0 %v101_v38  ;;  %171 = vmatpush.msra.mxu1 %v102_v39  ;;  %v244_v4 = vld [vmem:[#allocation8 + $0x130] sm:$0xff]  ;;  %v840_v5 = vld [vmem:[#allocation3 + $0x8] sm:$0xff]  ;;  %v215_v8 = vld [vmem:[#allocation8 + $0x48] sm:$0xff] }
  0x2c   :  { %194 = vmatpush.msra.mxu2 %v103_v40  ;;  %261 = vmatpush.msra.mxu3 %v230_v49  ;;  %v240_v6 = vld [vmem:[#allocation8 + $0x110] sm:$0xff]  ;;  %v241_v7 = vld [vmem:[#allocation8 + $0x118] sm:$0xff]  ;;  %v238_v10 = vld [vmem:[#allocation8 + $0x100] sm:$0xff] }
  0x2d   :  { %149 = vmatpush.msra.mxu0 %v98_v42  ;;  %172 = vmatpush.msra.mxu1 %v99_v43  ;;  %v237_v9 = vld [vmem:[#allocation8 + $0xf8] sm:$0xff]  ;;  %v212_v11 = vld [vmem:[#allocation8 + $0x30] sm:$0xff]  ;;  %v234_v12 = vld [vmem:[#allocation8 + $0xe0] sm:$0xff] }
  0x2e   :  { %195 = vmatpush.msra.mxu2 %v100_v44  ;;  %262 = vmatpush.msra.mxu3 %v227_v53  ;;  %v235_v13 = vld [vmem:[#allocation8 + $0xe8] sm:$0xff]  ;;  %v209_v14 = vld [vmem:[#allocation8 + $0x18] sm:$0xff]  ;;  %v232_v16 = vld [vmem:[#allocation8 + $0xd0] sm:$0xff] }
  0x2f   :  { %150 = vmatpush.msra.mxu0 %v95_v46  ;;  %173 = vmatpush.msra.mxu1 %v96_v47  ;;  %v231_v15 = vld [vmem:[#allocation8 + $0xc8] sm:$0xff]  ;;  %v206_v17 = vld [vmem:[#allocation8] sm:$0xff]  ;;  %v228_v18 = vld [vmem:[#allocation8 + $0xb0] sm:$0xff] }
  0x30   :  { %196 = vmatpush.msra.mxu2 %v97_v48  ;;  %263 = vmatpush.msra.mxu3 %v224_v60  ;;  %v229_v19 = vld [vmem:[#allocation8 + $0xb8] sm:$0xff]  ;;  %v226_v21 = vld [vmem:[#allocation8 + $0xa0] sm:$0xff]  ;;  %v223_v23 = vld [vmem:[#allocation8 + $0x88] sm:$0xff] }
  0x31   :  { %151 = vmatpush.msra.mxu0 %v92_v50  ;;  %174 = vmatpush.msra.mxu1 %v93_v51  ;;  %v225_v20 = vld [vmem:[#allocation8 + $0x98] sm:$0xff]  ;;  %v222_v22 = vld [vmem:[#allocation8 + $0x80] sm:$0xff]  ;;  %v219_v24 = vld [vmem:[#allocation8 + $0x68] sm:$0xff] }
  0x32   :  { %197 = vmatpush.msra.mxu2 %v94_v52  ;;  %264 = vmatpush.msra.mxu3 %v221_v63  ;;  %v220_v25 = vld [vmem:[#allocation8 + $0x70] sm:$0xff]  ;;  %v217_v27 = vld [vmem:[#allocation8 + $0x58] sm:$0xff]  ;;  %v214_v29 = vld [vmem:[#allocation8 + $0x40] sm:$0xff] }
  0x33   :  { %152 = vmatpush.msra.mxu0 %v89_v54  ;;  %175 = vmatpush.msra.mxu1 %v90_v55  ;;  %v216_v26 = vld [vmem:[#allocation8 + $0x50] sm:$0xff]  ;;  %v213_v28 = vld [vmem:[#allocation8 + $0x38] sm:$0xff]  ;;  %v210_v30 = vld [vmem:[#allocation8 + $0x20] sm:$0xff] }
  0x34   :  { %198 = vmatpush.msra.mxu2 %v91_v56  ;;  %153 = vmatmul.f32.vlgmr.msra.gmra.mxu0 %v835_v57  ;;  %v211_v31 = vld [vmem:[#allocation8 + $0x28] sm:$0xff]  ;;  %v208_v33 = vld [vmem:[#allocation8 + $0x10] sm:$0xff]  ;;  %v466_v34 = vld [vmem:[#allocation9 + $0x78] sm:$0xff] }
  0x35   :  { %176 = vmatmul.f32.vlgmr.msra.gmra.mxu1 %v835_v57  ;;  %199 = vmatmul.f32.vlgmr.msra.gmra.mxu2 %v835_v57  ;;  %v207_v32 = vld [vmem:[#allocation8 + $0x8] sm:$0xff]  ;;  %v482_v35 = vld [vmem:[#allocation9 + $0xf8] sm:$0xff]  ;;  %v465_v36 = vld [vmem:[#allocation9 + $0x70] sm:$0xff] }
  0x36   :  { %277 = vmatpush.msrb.mxu0 %v252_v58  ;;  %300 = vmatpush.msrb.mxu1 %v253_v59  ;;  %v481_v37 = vld [vmem:[#allocation9 + $0xf0] sm:$0xff]  ;;  %v464_v38 = vld [vmem:[#allocation9 + $0x68] sm:$0xff]  ;;  %v463_v40 = vld [vmem:[#allocation9 + $0x60] sm:$0xff] }
  0x37   :  { %265 = vmatpush.msra.mxu3 %v218_v2  ;;  %499 = vmatpush.msrb.mxu2 %v466_v34  ;;  %v480_v39 = vld [vmem:[#allocation9 + $0xe8] sm:$0xff]  ;;  %v498_v41 = vld [vmem:[#allocation9 + $0x178] sm:$0xff]  ;;  %v479_v42 = vld [vmem:[#allocation9 + $0xe0] sm:$0xff] }
  0x38   :  { %278 = vmatpush.msrb.mxu0 %v249_v61  ;;  %301 = vmatpush.msrb.mxu1 %v250_v62  ;;  %v462_v43 = vld [vmem:[#allocation9 + $0x58] sm:$0xff]  ;;  %v497_v44 = vld [vmem:[#allocation9 + $0x170] sm:$0xff]  ;;  %v496_v47 = vld [vmem:[#allocation9 + $0x168] sm:$0xff] }
  0x39   :  { %266 = vmatpush.msra.mxu3 %v215_v8  ;;  %500 = vmatpush.msrb.mxu2 %v465_v36  ;;  %v478_v45 = vld [vmem:[#allocation9 + $0xd8] sm:$0xff]  ;;  %v461_v46 = vld [vmem:[#allocation9 + $0x50] sm:$0xff]  ;;  %v460_v49 = vld [vmem:[#allocation9 + $0x48] sm:$0xff] }
  0x3a   :  { %279 = vmatpush.msrb.mxu0 %v246_v0  ;;  %302 = vmatpush.msrb.mxu1 %v247_v1  ;;  %v477_v48 = vld [vmem:[#allocation9 + $0xd0] sm:$0xff]  ;;  %v495_v50 = vld [vmem:[#allocation9 + $0x160] sm:$0xff]  ;;  %v476_v51 = vld [vmem:[#allocation9 + $0xc8] sm:$0xff] }
  0x3b   :  { %267 = vmatpush.msra.mxu3 %v212_v11  ;;  %501 = vmatpush.msrb.mxu2 %v464_v38  ;;  %v459_v52 = vld [vmem:[#allocation9 + $0x40] sm:$0xff]  ;;  %v494_v53 = vld [vmem:[#allocation9 + $0x158] sm:$0xff]  ;;  %v493_v56 = vld [vmem:[#allocation9 + $0x150] sm:$0xff] }
  0x3c   :  { %280 = vmatpush.msrb.mxu0 %v243_v3  ;;  %303 = vmatpush.msrb.mxu1 %v244_v4  ;;  %v475_v54 = vld [vmem:[#allocation9 + $0xc0] sm:$0xff]  ;;  %v458_v55 = vld [vmem:[#allocation9 + $0x38] sm:$0xff]  ;;  %v457_v58 = vld [vmem:[#allocation9 + $0x30] sm:$0xff] }
  0x3d   :  { %156 = vmatmul.f32.gmra.mxu0 %v840_v5  ;;  %179 = vmatmul.f32.gmra.mxu1 %v840_v5  ;;  %v492_v59 = vld [vmem:[#allocation9 + $0x148] sm:$0xff]  ;;  %v473_v60 = vld [vmem:[#allocation9 + $0xb0] sm:$0xff]  ;;  %v491_v62 = vld [vmem:[#allocation9 + $0x140] sm:$0xff] }
  0x3e   :  { %202 = vmatmul.f32.gmra.mxu2 %v840_v5  ;;  %281 = vmatpush.msrb.mxu0 %v240_v6  ;;  %v456_v61 = vld [vmem:[#allocation9 + $0x28] sm:$0xff]  ;;  %v455_v0 = vld [vmem:[#allocation9 + $0x20] sm:$0xff]  ;;  %v490_v1 = vld [vmem:[#allocation9 + $0x138] sm:$0xff] }
  0x3f   :  { %304 = vmatpush.msrb.mxu1 %v241_v7  ;;  %268 = vmatpush.msra.mxu3 %v209_v14  ;;  %v472_v63 = vld [vmem:[#allocation9 + $0xa8] sm:$0xff]  ;;  %v471_v2 = vld [vmem:[#allocation9 + $0xa0] sm:$0xff]  ;;  %v454_v3 = vld [vmem:[#allocation9 + $0x18] sm:$0xff] }
  0x40   :  { %282 = vmatpush.msrb.mxu0 %v237_v9  ;;  %502 = vmatpush.msrb.mxu2 %v463_v40  ;;  %v489_v4 = vld [vmem:[#allocation9 + $0x130] sm:$0xff]  ;;  %v488_v8 = vld [vmem:[#allocation9 + $0x128] sm:$0xff]  ;;  %v487_v14 = vld [vmem:[#allocation9 + $0x120] sm:$0xff] }
  0x41   :  { %305 = vmatpush.msrb.mxu1 %v238_v10  ;;  %269 = vmatpush.msra.mxu3 %v206_v17  ;;  %v453_v7 = vld [vmem:[#allocation9 + $0x10] sm:$0xff]  ;;  %v486_v17 = vld [vmem:[#allocation9 + $0x118] sm:$0xff] }
  0x42   :  { %283 = vmatpush.msrb.mxu0 %v234_v12  ;;  %270 = vmatmul.f32.vlgmr.msra.gmra.mxu3 %v835_v57  ;;  %v469_v11 = vld [vmem:[#allocation9 + $0x90] sm:$0xff] }
  0x43   :  { %306 = vmatpush.msrb.mxu1 %v235_v13  ;;  %522 = vmatpush.msrb.mxu3 %v482_v35  ;;  %v452_v13 = vld [vmem:[#allocation9 + $0x8] sm:$0xff] }
  0x44   :  { %284 = vmatpush.msrb.mxu0 %v231_v15  ;;  %503 = vmatpush.msrb.mxu2 %v462_v43  ;;  %v468_v15 = vld [vmem:[#allocation9 + $0x88] sm:$0xff] }
  0x45   :  { %307 = vmatpush.msrb.mxu1 %v232_v16  ;;  %523 = vmatpush.msrb.mxu3 %v481_v37  ;;  %v451_v16 = vld [vmem:[#allocation9] sm:$0xff] }
  0x46   :  { %285 = vmatpush.msrb.mxu0 %v228_v18  ;;  %504 = vmatpush.msrb.mxu2 %v461_v46  ;;  %v467_v18 = vld [vmem:[#allocation9 + $0x80] sm:$0xff] }
  0x47   :  { %308 = vmatpush.msrb.mxu1 %v229_v19  ;;  %524 = vmatpush.msrb.mxu3 %v480_v39  ;;  %v485_v19 = vld [vmem:[#allocation9 + $0x110] sm:$0xff] }
  0x48   :  { %286 = vmatpush.msrb.mxu0 %v225_v20  ;;  %505 = vmatpush.msrb.mxu2 %v460_v49 }
  0x49   :  { %309 = vmatpush.msrb.mxu1 %v226_v21  ;;  %525 = vmatpush.msrb.mxu3 %v479_v42 }
  0x4a   :  { %287 = vmatpush.msrb.mxu0 %v222_v22  ;;  %273 = vmatmul.f32.gmra.mxu3 %v840_v5  ;;  %v484_v22 = vld [vmem:[#allocation9 + $0x108] sm:$0xff] }
  0x4b   :  { %310 = vmatpush.msrb.mxu1 %v223_v23  ;;  %526 = vmatpush.msrb.mxu3 %v478_v45 }
  0x4c   :  { %288 = vmatpush.msrb.mxu0 %v219_v24  ;;  %506 = vmatpush.msrb.mxu2 %v459_v52 }
  0x4d   :  { %311 = vmatpush.msrb.mxu1 %v220_v25  ;;  %527 = vmatpush.msrb.mxu3 %v477_v48 }
  0x4e   :  { %289 = vmatpush.msrb.mxu0 %v216_v26  ;;  %507 = vmatpush.msrb.mxu2 %v458_v55 }
  0x4f   :  { %312 = vmatpush.msrb.mxu1 %v217_v27  ;;  %528 = vmatpush.msrb.mxu3 %v476_v51 }
  0x50   :  { %290 = vmatpush.msrb.mxu0 %v213_v28  ;;  %508 = vmatpush.msrb.mxu2 %v457_v58 }
  0x51   :  { %313 = vmatpush.msrb.mxu1 %v214_v29  ;;  %529 = vmatpush.msrb.mxu3 %v475_v54  ;;  %v483_v29 = vld [vmem:[#allocation9 + $0x100] sm:$0xff] }
  0x52   :  { %291 = vmatpush.msrb.mxu0 %v210_v30  ;;  %509 = vmatpush.msrb.mxu2 %v456_v61 }
  0x53   :  { %314 = vmatpush.msrb.mxu1 %v211_v31 }
  0x54   :  { %292 = vmatpush.msrb.mxu0 %v207_v32  ;;  %510 = vmatpush.msrb.mxu2 %v455_v0 }
  0x55   :  { %293 = vmatmul.f32.vlgmr.msrb.gmra.mxu0 %v835_v57  ;;  %315 = vmatpush.msrb.mxu1 %v208_v33 }
  0x56   :  { %316 = vmatmul.f32.vlgmr.msrb.gmra.mxu1 %v835_v57  ;;  %545 = vmatpush.msra.mxu0 %v498_v41  ;;  %v474_v57 = vld [vmem:[#allocation9 + $0xb8] sm:$0xff] }
  0x57   :  { %606 = vmatpush.msra.mxu1 %v498_v41  ;;  %530 = vmatpush.msrb.mxu3 %v474_v57 }
  0x58   :  { %546 = vmatpush.msra.mxu0 %v497_v44  ;;  %511 = vmatpush.msrb.mxu2 %v454_v3 }
  0x59   :  { %607 = vmatpush.msra.mxu1 %v497_v44  ;;  %531 = vmatpush.msrb.mxu3 %v473_v60 }
  0x5a   :  { %547 = vmatpush.msra.mxu0 %v496_v47  ;;  %512 = vmatpush.msrb.mxu2 %v453_v7 }
  0x5b   :  { %608 = vmatpush.msra.mxu1 %v496_v47  ;;  %532 = vmatpush.msrb.mxu3 %v472_v63 }
  0x5c   :  { %548 = vmatpush.msra.mxu0 %v495_v50  ;;  %513 = vmatpush.msrb.mxu2 %v452_v13 }
  0x5d   :  { %296 = vmatmul.f32.gmra.mxu0 %v840_v5  ;;  %609 = vmatpush.msra.mxu1 %v495_v50 }
  0x5e   :  { %319 = vmatmul.f32.gmra.mxu1 %v840_v5  ;;  %549 = vmatpush.msra.mxu0 %v494_v53  ;;  %v470_v5 = vld [vmem:[#allocation9 + $0x98] sm:$0xff] }
  0x5f   :  { %610 = vmatpush.msra.mxu1 %v494_v53  ;;  %533 = vmatpush.msrb.mxu3 %v471_v2 }
  0x60   :  { %550 = vmatpush.msra.mxu0 %v493_v56  ;;  %514 = vmatpush.msrb.mxu2 %v451_v16 }
  0x61   :  { %611 = vmatpush.msra.mxu1 %v493_v56  ;;  %534 = vmatpush.msrb.mxu3 %v470_v5 }
  0x62   :  { %551 = vmatpush.msra.mxu0 %v492_v59 }
  0x63   :  { %612 = vmatpush.msra.mxu1 %v492_v59  ;;  %535 = vmatpush.msrb.mxu3 %v469_v11 }
  0x64   :  { %552 = vmatpush.msra.mxu0 %v491_v62 }
  0x65   :  { %613 = vmatpush.msra.mxu1 %v491_v62  ;;  %536 = vmatpush.msrb.mxu3 %v468_v15 }
  0x66   :  { %553 = vmatpush.msra.mxu0 %v490_v1 }
  0x67   :  { %614 = vmatpush.msra.mxu1 %v490_v1  ;;  %537 = vmatpush.msrb.mxu3 %v467_v18 }
  0x68   :  { %554 = vmatpush.msra.mxu0 %v489_v4 }
  0x69   :  { %615 = vmatpush.msra.mxu1 %v489_v4 }
  0x6a   :  { %555 = vmatpush.msra.mxu0 %v488_v8 }
  0x6b   :  { %616 = vmatpush.msra.mxu1 %v488_v8 }
  0x6c   :  { %556 = vmatpush.msra.mxu0 %v487_v14 }
  0x6d   :  { %617 = vmatpush.msra.mxu1 %v487_v14 }
  0x6e   :  { %557 = vmatpush.msra.mxu0 %v486_v17 }
  0x6f   :  { %618 = vmatpush.msra.mxu1 %v486_v17 }
  0x70   :  { %558 = vmatpush.msra.mxu0 %v485_v19 }
  0x71   :  { %619 = vmatpush.msra.mxu1 %v485_v19 }
  0x72   :  { %559 = vmatpush.msra.mxu0 %v484_v22 }
  0x73   :  { %620 = vmatpush.msra.mxu1 %v484_v22 }
  0x74   :  { %560 = vmatpush.msra.mxu0 %v483_v29 }
  0x75   :  { %621 = vmatpush.msra.mxu1 %v483_v29 }
  0xb1   :  { %v851_v6 = vpop.f32.mrf.mxu0 }
  0xb2   :  { %v600_v9 = vmul.f32 -1.442695, %v851_v6  ;;  %v854_v10 = vpop.f32.mrf.mxu1 }
  0xb3   :  { %v601_v12 = vmul.f32 -1.442695, %v854_v10 }
  0xb4   :  { %631 = vpow2.f32 %v600_v9 }
  0xb5   :  { %633 = vpow2.f32 %v601_v12 }
  0xb8   :  { %v857_v20 = vpop.f32.mrf.mxu2 }
  0xb9   :  { %v602_v21 = vmul.f32 -1.442695, %v857_v20 }
  0xba   :  { %v632_v23 = vpop.eup %631  ;;  %v860_v24 = vpop.f32.mrf.mxu0 }
  0xbb   :  { %v862_v25 = vpop.f32.mrf.mxu1  ;;  %v634_v26 = vpop.eup %633  ;;  %v341_v27 = vadd.f32 1.0, %v632_v23  ;;  %635 = vpow2.f32 %v602_v21  ;;  %v603_v28 = vmul.f32 -1.442695, %v860_v24 }
  0xbc   :  { %v342_v30 = vadd.f32 1.0, %v634_v26  ;;  %v604_v31 = vmul.f32 -1.442695, %v862_v25 }
  0xbd   :  { %637 = vrcp.f32 %v341_v27  ;;  %v356_v43 = vand.u32 2147483647, %v341_v27  ;;  %v358_v45 = vand.u32 2147483648, %v341_v27  ;;  %vm352_vm2 = vweird.f32 %v341_v27 }
  0xbe   :  { %639 = vrcp.f32 %v342_v30  ;;  %v371_v47 = vand.u32 2147483647, %v342_v30  ;;  %v373_v50 = vand.u32 2147483648, %v342_v30  ;;  %vm367_vm4 = vweird.f32 %v342_v30 }
  0xbf   :  { %641 = vpow2.f32 %v603_v28  ;;  %vm357_vm3 = vcmp.eq.f32.partialorder %v356_v43, 8.507059e+37  ;;  %v359_v54 = vor.u32 1.1754944e-38, %v358_v45 }
  0xc0   :  { %643 = vpow2.f32 %v604_v31  ;;  %vm372_vm6 = vcmp.eq.f32.partialorder %v371_v47, 8.507059e+37  ;;  %v374_v59 = vor.u32 1.1754944e-38, %v373_v50 }
  0xc1   :  { %v636_v32 = vpop.eup %635  ;;  %v866_v33 = vpop.f32.mrf.mxu2 }
  0xc2   :  { %v343_v34 = vadd.f32 1.0, %v636_v32  ;;  %v605_v35 = vmul.f32 -1.442695, %v866_v33 }
  0xc3   :  { %v638_v36 = vpop.eup %637 }
  0xc4   :  { %v640_v37 = vpop.eup %639  ;;  %v348_v38 = vmul.f32 %v638_v36, %v341_v27  ;;  %645 = vrcp.f32 %v343_v34  ;;  %vm353_vm0 = vweird.f32 %v638_v36  ;;  %v386_v60 = vand.u32 2147483647, %v343_v34 }
  0xc5   :  { %v642_v39 = vpop.eup %641  ;;  %v363_v40 = vmul.f32 %v640_v37, %v342_v30  ;;  %647 = vpow2.f32 %v605_v35  ;;  %vm368_vm1 = vweird.f32 %v640_v37  ;;  %vm354_vm5 = vmor %vm352_vm2, %vm353_vm0  ;;  %v388_v61 = vand.u32 2147483648, %v343_v34  ;;  %v271_v5 = vpop.f32.mrf.mxu3 }
  0xc6   :  { %v644_v41 = vpop.eup %643  ;;  %v349_v42 = vsub.f32 1.0, %v348_v38  ;;  %v869_v44 = vadd.f32 1.0, %v642_v39  ;;  %vm369_vm7 = vmor %vm367_vm4, %vm368_vm1  ;;  %vm382_vm8 = vweird.f32 %v343_v34  ;;  %vm880_vm10 = vcmp.eq.f32.partialorder %v386_v60, 8.507059e+37 }
  0xc7   :  { %v364_v46 = vsub.f32 1.0, %v363_v40  ;;  %v871_v48 = vadd.f32 1.0, %v644_v41 }
  0xc8   :  { %v350_v49 = vmul.f32 %v638_v36, %v349_v42  ;;  %649 = vrcp.f32 %v869_v44  ;;  %v401_v16 = vand.u32 2147483647, %v869_v44  ;;  %v403_v17 = vand.u32 2147483648, %v869_v44 }
  0xc9   :  { %v365_v51 = vmul.f32 %v640_v37, %v364_v46  ;;  %651 = vrcp.f32 %v871_v48  ;;  %v416_v19 = vand.u32 2147483647, %v871_v48  ;;  %v418_v26 = vand.u32 2147483648, %v871_v48 }
  0xca   :  { %v646_v52 = vpop.eup %645  ;;  %v351_v53 = vadd.f32 %v638_v36, %v350_v49  ;;  %vm397_vm14 = vweird.f32 %v869_v44  ;;  %vm402_vm0 = vcmp.eq.f32.partialorder %v401_v16, 8.507059e+37  ;;  %v404_v35 = vor.u32 1.1754944e-38, %v403_v17 }
  0xcb   :  { %v366_v55 = vadd.f32 %v640_v37, %v365_v51  ;;  %v378_v56 = vmul.f32 %v646_v52, %v343_v34  ;;  %v648_v57 = vpop.eup %647  ;;  %vm383_vm9 = vweird.f32 %v646_v52  ;;  %vm412_vm1 = vweird.f32 %v871_v48 }
  0xcc   :  { %v355_v58 = vsel %vm354_vm5, %v638_v36, %v351_v53  ;;  %v875_v1 = vadd.f32 1.0, %v648_v57  ;;  %vm384_vm11 = vmor %vm382_vm8, %vm383_vm9  ;;  %v419_v38 = vor.u32 1.1754944e-38, %v418_v26 }
  0xcd   :  { %v360_v62 = vsel %vm357_vm3, %v359_v54, %v355_v58  ;;  %v370_v63 = vsel %vm369_vm7, %v640_v37, %v366_v55  ;;  %v379_v0 = vsub.f32 1.0, %v378_v56  ;;  %vm417_vm3 = vcmp.eq.f32.partialorder %v416_v19, 8.507059e+37  ;;  %v274_v42 = vpop.f32.mrf.mxu3 }
  0xce   :  { %v650_v2 = vpop.eup %649  ;;  %v437_v3 = vmul.f32 %v360_v62, %v851_v6  ;;  %v375_v4 = vsel %vm372_vm6, %v374_v59, %v370_v63  ;;  %653 = vrcp.f32 %v875_v1  ;;  %v389_v6 = vor.u32 1.1754944e-38, %v388_v61 }
  0xcf   :  { %v652_v7 = vpop.eup %651  ;;  %v380_v8 = vmul.f32 %v646_v52, %v379_v0  ;;  %v393_v9 = vmul.f32 %v650_v2, %v869_v44  ;;  %v438_v11 = vmul.f32 %v375_v4, %v854_v10  ;;  %vm398_vm12 = vweird.f32 %v650_v2 }
  0xd0   :  { %v408_v13 = vmul.f32 %v652_v7, %v871_v48  ;;  %v443_v10 = vmul.f32 %v437_v3, %v271_v5  ;;  %vm413_vm13 = vweird.f32 %v652_v7  ;;  %vm399_vm15 = vmor %vm397_vm14, %vm398_vm12  ;;  %v433_v47 = vand.u32 2147483648, %v875_v1 }
  0xd1   :  { %v381_v14 = vadd.f32 %v646_v52, %v380_v8  ;;  %v394_v15 = vsub.f32 1.0, %v393_v9  ;;  %vm414_vm2 = vmor %vm412_vm1, %vm413_vm13  ;;  %v431_v50 = vand.u32 2147483647, %v875_v1  ;;  %vm427_vm5 = vweird.f32 %v875_v1 }
  0xd2   :  { %v409_v18 = vsub.f32 1.0, %v408_v13  ;;  %v294_v21 = vpop.f32.mrf.mxu0  ;;  %515 = vmatmul.f32.vlgmr.msrb.gmra.mxu2 %v443_v10 }
  0xd3   :  { %v385_v22 = vsel %vm384_vm11, %v646_v52, %v381_v14  ;;  %v395_v23 = vmul.f32 %v650_v2, %v394_v15  ;;  %v444_v29 = vmul.f32 %v438_v11, %v294_v21  ;;  %v317_v30 = vpop.f32.mrf.mxu1  ;;  %vm432_vm7 = vcmp.eq.f32.partialorder %v431_v50, 8.507059e+37 }
  0xd4   :  { %v390_v27 = vsel %vm880_vm10, %v389_v6, %v385_v22  ;;  %v410_v28 = vmul.f32 %v652_v7, %v409_v18  ;;  %v654_v34 = vpop.eup %653 }
  0xd5   :  { %v439_v31 = vmul.f32 %v390_v27, %v857_v20  ;;  %v396_v32 = vadd.f32 %v650_v2, %v395_v23  ;;  %538 = vmatmul.f32.vlgmr.msrb.gmra.mxu3 %v444_v29  ;;  %v423_v39 = vmul.f32 %v654_v34, %v875_v1  ;;  %vm428_vm4 = vweird.f32 %v654_v34 }
  0xd6   :  { %v411_v36 = vadd.f32 %v652_v7, %v410_v28  ;;  %vm429_vm6 = vmor %vm427_vm5, %vm428_vm4 }
  0xd7   :  { %v400_v37 = vsel %vm399_vm15, %v650_v2, %v396_v32  ;;  %v445_v40 = vmul.f32 %v439_v31, %v317_v30  ;;  %v424_v45 = vsub.f32 1.0, %v423_v39 }
  0xd8   :  { %v405_v41 = vsel %vm402_vm0, %v404_v35, %v400_v37  ;;  %v415_v20 = vsel %vm414_vm2, %v652_v7, %v411_v36 }
  0xd9   :  { %v440_v43 = vmul.f32 %v405_v41, %v860_v24  ;;  %v420_v44 = vsel %vm417_vm3, %v419_v38, %v415_v20  ;;  %561 = vmatmul.f32.vlgmr.msra.gmra.mxu0 %v445_v40  ;;  %v425_v49 = vmul.f32 %v654_v34, %v424_v45  ;;  %v434_v24 = vor.u32 1.1754944e-38, %v433_v47 }
  0xda   :  { %v441_v46 = vmul.f32 %v420_v44, %v862_v25  ;;  %v297_v48 = vpop.f32.mrf.mxu0 }
  0xdb   :  { %v446_v51 = vmul.f32 %v440_v43, %v274_v42  ;;  %v426_v53 = vadd.f32 %v654_v34, %v425_v49  ;;  %v320_v25 = vpop.f32.mrf.mxu1 }
  0xdc   :  { %v447_v52 = vmul.f32 %v441_v46, %v297_v48 }
  0xdd   :  { %518 = vmatmul.f32.gmra.mxu2 %v446_v51  ;;  %v430_v54 = vsel %vm429_vm6, %v654_v34, %v426_v53 }
  0xde   :  { %541 = vmatmul.f32.gmra.mxu3 %v447_v52  ;;  %v435_v55 = vsel %vm432_vm7, %v434_v24, %v430_v54 }
  0xdf   :  { %v442_v56 = vmul.f32 %v435_v55, %v866_v33 }
  0xe1   :  { %v448_v57 = vmul.f32 %v442_v56, %v320_v25 }
  0xe3   :  { %564 = vmatmul.f32.vlgmr.msra.gmra.mxu1 %v448_v57 }
 0x155   :  { %v516_v58 = vpop.f32.mrf.mxu2 }
 0x156   :  { %v562_v61 = vpop.f32.mrf.mxu0 }
 0x158   :  { %v539_v59 = vpop.f32.mrf.mxu3 }
 0x159   :  { %v540_v60 = vadd.f32 %v539_v59, %v516_v58 }
 0x15b   :  { %v563_v62 = vadd.f32 %v562_v61, %v540_v60 }
 0x15d   :  { %577 = vst [vmem:[#allocation11] sm:$0xff] %v563_v62 }
 0x160   :  { %v519_v63 = vpop.f32.mrf.mxu2  ;;  %v565_v2 = vpop.f32.mrf.mxu1 }
 0x161   :  { %v542_v0 = vpop.f32.mrf.mxu3 }
 0x162   :  { %v543_v1 = vadd.f32 %v542_v0, %v519_v63 }
 0x164   :  { %v566_v3 = vadd.f32 %v565_v2, %v543_v1 }
 0x166   :  { %578 = vst [vmem:[#allocation11 + $0x8] sm:$0xff] %v566_v3 }
 0x167   :  { %591 = dma.vmem_to_hbm [thread:$0]  %s584_s3, 256, %s586_s13, [#allocation5], %s787_s27, %s787_s27, %s788_s28  }
 0x168   :  { %781 = dma.done.wait [#allocation5], 256  }
 0x169   :  { %782 = vsyncadd [#allocation5], 4294967040 }
 0x16a   :  { %596 = vsyncpa [#allocation4], 1 }
 0x16b   :  { %597 = vsyncpa [#allocation7], 1 }
 0x16c   :  { %598 = vsyncpa [#allocation10], 1 }
 0x16d   :  { %599 = vsyncpa [#allocation5], 1 }

</bundles_post_ra>
